<compile_context>
chip_gen: v5e
topology: v5e:2x2
jax: 0.10.0
libtpu: 0.0.40
codegen_flags: <defaults>
</compile_context>

<pallas_src>
import jax
import jax.numpy as jnp
from jax import lax
from jax.experimental import pallas as pl
from jax.experimental.pallas import tpu as pltpu

EPS = 1e-5
_LANE = 128


def _vmem_capacity_bytes():
    """Physical per-TensorCore VMEM; conservative (v7x, 64 MiB) fallback."""
    try:
        info = pltpu.get_tpu_info()
        cap = int(getattr(info, "vmem_capacity_bytes", 0))
        if cap > 0:
            return cap
    except Exception:
        pass
    return 64 * 1024 * 1024


def _pick_tile_hw(hw_padded, c, itemsize, tile_budget_bytes):
    """Largest lane-dense (multiple-of-128) spatial tile that divides hw_padded
    and whose apply-pass footprint (2 input + 2 output pipeline buffers, each
    c * tile * itemsize bytes) fits the byte budget."""
    max_tile = tile_budget_bytes // (4 * c * itemsize)
    max_tile = max(_LANE, (max_tile // _LANE) * _LANE)
    tile = min(hw_padded, max_tile)
    tile -= tile % _LANE
    tile = max(tile, _LANE)
    while hw_padded % tile != 0:
        tile -= _LANE
    return tile


def _reduce_kernel(x_ref, sum_ref, sq_ref, acc_sum, acc_sq):
    # x_ref: (1, C, TILE_HW); sum_ref / sq_ref: (1, 1, C, 1) f32 output blocks
    # resident across the (arbitrary) tile axis; acc_*: (C, 128) f32 scratch.
    t = pl.program_id(2)

    @pl.when(t == 0)
    def _():
        acc_sum[...] = jnp.zeros_like(acc_sum)
        acc_sq[...] = jnp.zeros_like(acc_sq)

    n_chunks = x_ref.shape[2] // _LANE  # static: TILE_HW is a multiple of 128

    def accumulate(xc):
        xc = xc.astype(jnp.float32)          # (C, 128) chunk, VPU adds only
        acc_sum[...] += xc
        acc_sq[...] += xc * xc

    if n_chunks <= 16:
        # short static loop: fully visible to the scheduler, no temporaries
        for i in range(n_chunks):
            accumulate(x_ref[0, :, i * _LANE:(i + 1) * _LANE])
    else:
        def body(i, carry):
            off = pl.multiple_of(i * _LANE, _LANE)
            accumulate(x_ref[0, :, pl.ds(off, _LANE)])
            return carry

        lax.fori_loop(0, n_chunks, body, 0)

    # single cross-lane reduce + lane-1 store per (split, n) window
    @pl.when(t == pl.num_programs(2) - 1)
    def _():
        sum_ref[0, 0] = jnp.sum(acc_sum[...], axis=1, keepdims=True)
        sq_ref[0, 0] = jnp.sum(acc_sq[...], axis=1, keepdims=True)


def _apply_kernel(x_ref, scale_ref, shift_ref, y_ref):
    # x_ref / y_ref: (1, C, TILE_HW); scale/shift: (C, 1) f32.
    # f32 FMA (cast is a no-op for f32 activations).
    # TODO(synk): for bf16 activations on v6e/v7x this could compute in bf16.
    x = x_ref[0].astype(jnp.float32)
    y_ref[0] = (x * scale_ref[...] + shift_ref[...]).astype(y_ref.dtype)


def batchnorm2d(x, gamma, beta):
    """Training-mode BatchNorm2d forward. x: (N, C, H, W); gamma/beta: (C,)."""
    N, C, H, W = x.shape
    HW = H * W
    M = N * HW
    itemsize = x.dtype.itemsize

    # Chip-aware VMEM budgets: scoped limit <= half of physical per-core VMEM
    # (64 MiB on v6e/v5e, 32 MiB on v7x); tile bytes use ~60% of that, leaving
    # headroom for the reduce-pass scratch and compiler internals.
    vmem_cap = _vmem_capacity_bytes()
    vmem_limit = max(32 * 1024 * 1024, min(vmem_cap // 2, 96 * 1024 * 1024))
    tile_budget = (vmem_limit * 3) // 5

    # Free NCHW -> (N, C, HW) view; zero-pad HW to a lane multiple if needed
    # (zeros add nothing to sum / sum-of-squares; padded outputs are sliced off).
    hw_pad = ((HW + _LANE - 1) // _LANE) * _LANE
    x_v = x.reshape(N, C, HW)
    if hw_pad != HW:
        x_v = jnp.pad(x_v, ((0, 0), (0, 0), (0, hw_pad - HW)))

    tile_hw = _pick_tile_hw(hw_pad, C, itemsize, tile_budget)
    n_tiles = hw_pad // tile_hw

    # v7x megacore: if there is no batch parallelism, split the spatial tiles
    # across a leading parallel axis so both TensorCores work on pass 1.
    split = 2 if (N == 1 and n_tiles % 2 == 0) else 1
    tps = n_tiles // split

    # ---- pass 1: partial per-channel statistics --------------------------
    psum, psq = pl.pallas_call(
        _reduce_kernel,
        out_shape=(
            jax.ShapeDtypeStruct((split, N, C, 1), jnp.float32),
            jax.ShapeDtypeStruct((split, N, C, 1), jnp.float32),
        ),
        grid=(split, N, tps),
        in_specs=[pl.BlockSpec((1, C, tile_hw),
                               lambda s, n, t: (n, 0, s * tps + t))],
        out_specs=(
            pl.BlockSpec((1, 1, C, 1), lambda s, n, t: (s, n, 0, 0)),
            pl.BlockSpec((1, 1, C, 1), lambda s, n, t: (s, n, 0, 0)),
        ),
        scratch_shapes=[
            pltpu.VMEM((C, _LANE), jnp.float32),
            pltpu.VMEM((C, _LANE), jnp.float32),
        ],
        compiler_params=pltpu.CompilerParams(
            dimension_semantics=("parallel", "parallel", "arbitrary"),
            vmem_limit_bytes=vmem_limit,
        ),
    )(x_v)

    # ---- tiny combine in plain JAX: fold gamma/beta into scale/shift -----
    total_sum = jnp.sum(psum[..., 0], axis=(0, 1))        # (C,)
    total_sq = jnp.sum(psq[..., 0], axis=(0, 1))          # (C,)
    mean = total_sum / M
    # biased variance; clamp guards tiny negative values from cancellation
    var = jnp.maximum(total_sq / M - mean * mean, 0.0)
    inv_std = lax.rsqrt(var + EPS)
    g = gamma.astype(jnp.float32)
    b = beta.astype(jnp.float32)
    scale = (g * inv_std).reshape(C, 1)
    shift = (b - mean * g * inv_std).reshape(C, 1)

    # ---- pass 2: y = x * scale + shift, fully parallel tiled grid --------
    y_v = pl.pallas_call(
        _apply_kernel,
        out_shape=jax.ShapeDtypeStruct((N, C, hw_pad), x.dtype),
        grid=(N, n_tiles),
        in_specs=[
            pl.BlockSpec((1, C, tile_hw), lambda n, t: (n, 0, t)),
            pl.BlockSpec((C, 1), lambda n, t: (0, 0)),
            pl.BlockSpec((C, 1), lambda n, t: (0, 0)),
        ],
        out_specs=pl.BlockSpec((1, C, tile_hw), lambda n, t: (n, 0, t)),
        compiler_params=pltpu.CompilerParams(
            dimension_semantics=("parallel", "parallel"),
            vmem_limit_bytes=vmem_limit,
        ),
    )(x_v, scale, shift)

    if hw_pad != HW:
        y_v = y_v[:, :, :HW]
    return y_v.reshape(N, C, H, W)


if __name__ == "__main__":
    key = jax.random.PRNGKey(0)
    N, C, H, W = 2, 4, 16, 16
    x = jax.random.normal(key, (N, C, H, W), dtype=jnp.float32)

    # Deterministic parameter init matching nn.BatchNorm2d defaults.
    gamma = jnp.ones((C,), dtype=jnp.float32)
    beta = jnp.zeros((C,), dtype=jnp.float32)

    y = batchnorm2d(x, gamma, beta)
    y = jax.block_until_ready(y)

    # Pure-JAX reference check (training-mode batch norm, biased variance).
    mean = jnp.mean(x, axis=(0, 2, 3), keepdims=True)
    var = jnp.mean((x - mean) ** 2, axis=(0, 2, 3), keepdims=True)
    ref = (x - mean) / jnp.sqrt(var + EPS) * gamma.reshape(1, C, 1, 1) \
        + beta.reshape(1, C, 1, 1)
    assert y.shape == (N, C, H, W)
    assert jnp.max(jnp.abs(y - ref)) < 1e-4, "mismatch vs reference"

    print("KERNEL_OK")
</pallas_src>

<mosaic_0001>
module attributes {stable_mosaic.version = 11 : i64} {
  func.func @_reduce_kernel(%arg0: i32, %arg1: i32, %arg2: i32, %arg3: memref<1x4x256xf32, #tpu.memory_space<vmem>>, %arg4: memref<1x1x4x1xf32, #tpu.memory_space<vmem>>, %arg5: memref<1x1x4x1xf32, #tpu.memory_space<vmem>>, %arg6: memref<4x128xf32, #tpu.memory_space<vmem>>, %arg7: memref<4x128xf32, #tpu.memory_space<vmem>>) attributes {dimension_semantics = [#tpu.dimension_semantics<parallel>, #tpu.dimension_semantics<parallel>, #tpu.dimension_semantics<arbitrary>], iteration_bounds = array<i64: 1, 2, 1>, scalar_prefetch = 0 : i64, scratch_operands = 2 : i64, tpu.core_type = #tpu.core_type<tc>, window_params = [{transform_indices = @transform_0, window_bounds = array<i64: 1, 4, 256>}, {transform_indices = @transform_1, window_bounds = array<i64: 1, 1, 4, 1>}, {transform_indices = @transform_2, window_bounds = array<i64: 1, 1, 4, 1>}]} {
    %c0_i32 = arith.constant 0 : i32
    %0 = arith.cmpi eq, %arg2, %c0_i32 : i32
    %1 = arith.extui %0 : i1 to i32
    %c0_i32_0 = arith.constant 0 : i32
    %2 = arith.cmpi ne, %1, %c0_i32_0 : i32
    scf.if %2 {
      %cst = arith.constant 0.000000e+00 : f32
      %24 = vector.broadcast %cst : f32 to vector<4x128xf32>
      %c0_23 = arith.constant 0 : index
      %c0_24 = arith.constant 0 : index
      %25 = vector.load %arg6[%c0_23, %c0_24] : memref<4x128xf32, #tpu.memory_space<vmem>>, vector<4x128xf32>
      tpu.vector_store %arg6[%c0_23, %c0_24], %24 {strides = array<i32>} : memref<4x128xf32, #tpu.memory_space<vmem>>, vector<4x128xf32>,
      %cst_25 = arith.constant 0.000000e+00 : f32
      %26 = vector.broadcast %cst_25 : f32 to vector<4x128xf32>
      %c0_26 = arith.constant 0 : index
      %c0_27 = arith.constant 0 : index
      %27 = vector.load %arg7[%c0_26, %c0_27] : memref<4x128xf32, #tpu.memory_space<vmem>>, vector<4x128xf32>
      tpu.vector_store %arg7[%c0_26, %c0_27], %26 {strides = array<i32>} : memref<4x128xf32, #tpu.memory_space<vmem>>, vector<4x128xf32>,
    } else {
    }
    %c0 = arith.constant 0 : index
    %c0_1 = arith.constant 0 : index
    %c0_2 = arith.constant 0 : index
    %3 = vector.load %arg3[%c0, %c0_1, %c0_2] : memref<1x4x256xf32, #tpu.memory_space<vmem>>, vector<1x4x128xf32>
    %4 = vector.shape_cast %3 : vector<1x4x128xf32> to vector<4x128xf32>
    %c0_3 = arith.constant 0 : index
    %c0_4 = arith.constant 0 : index
    %5 = vector.load %arg6[%c0_3, %c0_4] : memref<4x128xf32, #tpu.memory_space<vmem>>, vector<4x128xf32>
    %6 = arith.addf %5, %4 : vector<4x128xf32>
    %c0_5 = arith.constant 0 : index
    %c0_6 = arith.constant 0 : index
    %7 = vector.load %arg6[%c0_5, %c0_6] : memref<4x128xf32, #tpu.memory_space<vmem>>, vector<4x128xf32>
    tpu.vector_store %arg6[%c0_5, %c0_6], %6 {strides = array<i32>} : memref<4x128xf32, #tpu.memory_space<vmem>>, vector<4x128xf32>,
    %c0_7 = arith.constant 0 : index
    %c0_8 = arith.constant 0 : index
    %8 = vector.load %arg7[%c0_7, %c0_8] : memref<4x128xf32, #tpu.memory_space<vmem>>, vector<4x128xf32>
    %9 = arith.mulf %4, %4 : vector<4x128xf32>
    %10 = arith.addf %8, %9 : vector<4x128xf32>
    %c0_9 = arith.constant 0 : index
    %c0_10 = arith.constant 0 : index
    %11 = vector.load %arg7[%c0_9, %c0_10] : memref<4x128xf32, #tpu.memory_space<vmem>>, vector<4x128xf32>
    tpu.vector_store %arg7[%c0_9, %c0_10], %10 {strides = array<i32>} : memref<4x128xf32, #tpu.memory_space<vmem>>, vector<4x128xf32>,
    %c0_11 = arith.constant 0 : index
    %c0_12 = arith.constant 0 : index
    %c128 = arith.constant 128 : index
    %12 = vector.load %arg3[%c0_11, %c0_12, %c128] : memref<1x4x256xf32, #tpu.memory_space<vmem>>, vector<1x4x128xf32>
    %13 = vector.shape_cast %12 : vector<1x4x128xf32> to vector<4x128xf32>
    %c0_13 = arith.constant 0 : index
    %c0_14 = arith.constant 0 : index
    %14 = vector.load %arg6[%c0_13, %c0_14] : memref<4x128xf32, #tpu.memory_space<vmem>>, vector<4x128xf32>
    %15 = arith.addf %14, %13 : vector<4x128xf32>
    %c0_15 = arith.constant 0 : index
    %c0_16 = arith.constant 0 : index
    %16 = vector.load %arg6[%c0_15, %c0_16] : memref<4x128xf32, #tpu.memory_space<vmem>>, vector<4x128xf32>
    tpu.vector_store %arg6[%c0_15, %c0_16], %15 {strides = array<i32>} : memref<4x128xf32, #tpu.memory_space<vmem>>, vector<4x128xf32>,
    %c0_17 = arith.constant 0 : index
    %c0_18 = arith.constant 0 : index
    %17 = vector.load %arg7[%c0_17, %c0_18] : memref<4x128xf32, #tpu.memory_space<vmem>>, vector<4x128xf32>
    %18 = arith.mulf %13, %13 : vector<4x128xf32>
    %19 = arith.addf %17, %18 : vector<4x128xf32>
    %c0_19 = arith.constant 0 : index
    %c0_20 = arith.constant 0 : index
    %20 = vector.load %arg7[%c0_19, %c0_20] : memref<4x128xf32, #tpu.memory_space<vmem>>, vector<4x128xf32>
    tpu.vector_store %arg7[%c0_19, %c0_20], %19 {strides = array<i32>} : memref<4x128xf32, #tpu.memory_space<vmem>>, vector<4x128xf32>,
    %c0_i32_21 = arith.constant 0 : i32
    %21 = arith.cmpi eq, %arg2, %c0_i32_21 : i32
    %22 = arith.extui %21 : i1 to i32
    %c0_i32_22 = arith.constant 0 : i32
    %23 = arith.cmpi ne, %22, %c0_i32_22 : i32
    scf.if %23 {
      %c0_23 = arith.constant 0 : index
      %c0_24 = arith.constant 0 : index
      %24 = vector.load %arg6[%c0_23, %c0_24] : memref<4x128xf32, #tpu.memory_space<vmem>>, vector<4x128xf32>
      %cst = arith.constant dense<0.000000e+00> : vector<4xf32>
      %25 = vector.multi_reduction <add>, %24, %cst [1] : vector<4x128xf32> to vector<4xf32>
      %26 = vector.shape_cast %25 : vector<4xf32> to vector<4x1xf32>
      %c0_25 = arith.constant 0 : index
      %c0_26 = arith.constant 0 : index
      %c0_27 = arith.constant 0 : index
      %c0_28 = arith.constant 0 : index
      %27 = vector.load %arg4[%c0_25, %c0_26, %c0_27, %c0_28] : memref<1x1x4x1xf32, #tpu.memory_space<vmem>>, vector<1x1x4x1xf32>
      %28 = vector.shape_cast %27 : vector<1x1x4x1xf32> to vector<4x1xf32>
      %29 = vector.shape_cast %26 : vector<4x1xf32> to vector<1x1x4x1xf32>
      tpu.vector_store %arg4[%c0_25, %c0_26, %c0_27, %c0_28], %29 {strides = array<i32>} : memref<1x1x4x1xf32, #tpu.memory_space<vmem>>, vector<1x1x4x1xf32>,
      %c0_29 = arith.constant 0 : index
      %c0_30 = arith.constant 0 : index
      %30 = vector.load %arg7[%c0_29, %c0_30] : memref<4x128xf32, #tpu.memory_space<vmem>>, vector<4x128xf32>
      %cst_31 = arith.constant dense<0.000000e+00> : vector<4xf32>
      %31 = vector.multi_reduction <add>, %30, %cst_31 [1] : vector<4x128xf32> to vector<4xf32>
      %32 = vector.shape_cast %31 : vector<4xf32> to vector<4x1xf32>
      %c0_32 = arith.constant 0 : index
      %c0_33 = arith.constant 0 : index
      %c0_34 = arith.constant 0 : index
      %c0_35 = arith.constant 0 : index
      %33 = vector.load %arg5[%c0_32, %c0_33, %c0_34, %c0_35] : memref<1x1x4x1xf32, #tpu.memory_space<vmem>>, vector<1x1x4x1xf32>
      %34 = vector.shape_cast %33 : vector<1x1x4x1xf32> to vector<4x1xf32>
      %35 = vector.shape_cast %32 : vector<4x1xf32> to vector<1x1x4x1xf32>
      tpu.vector_store %arg5[%c0_32, %c0_33, %c0_34, %c0_35], %35 {strides = array<i32>} : memref<1x1x4x1xf32, #tpu.memory_space<vmem>>, vector<1x1x4x1xf32>,
    } else {
    }
    return
  }
  func.func @transform_0(%arg0: i32, %arg1: i32, %arg2: i32) -> (i32, i32, i32) {
    %c1_i32 = arith.constant 1 : i32
    %0 = arith.muli %arg0, %c1_i32 : i32
    %1 = arith.addi %0, %arg2 : i32
    %c0_i32 = arith.constant 0 : i32
    %c0_i32_0 = arith.constant 0 : i32
    return %arg1, %c0_i32, %1 : i32, i32, i32
  }
  func.func @transform_1(%arg0: i32, %arg1: i32, %arg2: i32) -> (i32, i32, i32, i32) {
    %c0_i32 = arith.constant 0 : i32
    %c0_i32_0 = arith.constant 0 : i32
    %c0_i32_1 = arith.constant 0 : i32
    return %arg0, %arg1, %c0_i32, %c0_i32_0 : i32, i32, i32, i32
  }
  func.func @transform_2(%arg0: i32, %arg1: i32, %arg2: i32) -> (i32, i32, i32, i32) {
    %c0_i32 = arith.constant 0 : i32
    %c0_i32_0 = arith.constant 0 : i32
    %c0_i32_1 = arith.constant 0 : i32
    return %arg0, %arg1, %c0_i32, %c0_i32_0 : i32, i32, i32, i32
  }
}

</mosaic_0001>

<bundles_post_ra>
// kernel: tpu_custom_call.1
= control target key start
LH: loop header
LB: loop body
LE: loop exit
PB: predicated region body
PF: predicated region fallthrough
CT: control target
= control target key end

     0   :  { %8 = vsyncpa [#allocation5], 0  ;;  %s660_s0 = inlined_call_operand.hbm [shape: f32[2,4,256], index: 0, kind: input, shape index: {}]   ;;  %s661_s1 = inlined_call_operand.vmem [shape: f32[1,2,4,1], index: 1, kind: output, shape index: {0}]   ;;  %s662_s2 = inlined_call_operand.vmem [shape: f32[1,2,4,1], index: 2, kind: output, shape index: {1}]  }
   0x1   :  { %10 = vsyncpa [#allocation5 + $0x1], 0  ;;  %s569_s9 = smov 0   ;;  %s571_s10 = smov 0  }
   0x2   :  { %s573_s11 = smov 0   ;;  %s575_s12 = smov 0  }
   0x3   :  { %s577_s13 = smov 0   ;;  %s579_s14 = smov 0  }
   0x4 LB: > { %s401_s15 = sadd.s32 4294967295, %s551_s14   ;;  %s31_s16 = sadd.s32 1, %s547_s13  ;;  %s551_s14 = sphi %s579_s14, %s16_s14   ;;  %s547_s13 = sphi %s577_s13, %s669_s13   ;;  %s543_s12 = sphi %s575_s12, %s668_s12   ;;  %s539_s11 = sphi %s573_s11, %s667_s11   ;;  %s535_s10 = sphi %s571_s10, %s666_s10   ;;  %s531_s9 = sphi %s569_s9, %s665_s9  }
   0x5   : > { %p33_p0 = scmp.ge.s32.totalorder %s31_s16, 2  ;;  %s46_s17 = sadd.s32 1, %s539_s11 }
   0x6   : > { %p53_p1 = scmp.ne.s32.totalorder %s539_s11, %s535_s10  ;;  %p54_p2 = scmp.eq.s32.totalorder %s551_s14, 0 }
   0x7   : > { %s671_s16 = smov (%p33_p0, %s31_s16), 0  ;;  %p59_p4 = scmp.ne.s32.totalorder %s535_s10, %s531_s9 }
   0x8   : > { %p605_p3 = por %p54_p2, %p53_p1  ;;  %s41_s19 = ssub.s32 %s547_s13, %s671_s16 }
   0x9   : > { %p60_p5 = scmp.eq.s32.totalorder %s401_s15, 0  ;;  %p44_p6 = scmp.eq.s32.totalorder %s41_s19, 0 }
   0xa   : > { %p421_p8 = scmp.lt.s32.totalorder %s551_s14, 2  ;;  %s139_s22 = sand.u32 1, %s539_s11  }
   0xb   : > { %p612_p7 = por %p60_p5, %p59_p4  ;;  %s414_s23 = sshll.u32 %s547_s13, 3 }
   0xc   : > { %s618_s21 = scalar_select %p44_p6, %s539_s11, %s46_s17  }
   0xd   : > { %s405_s24 = sshll.u32 %s139_s22, 3  ;;  %s151_s27 = scalar_lea.hbm %s660_s0, %s414_s23 }
   0xe   : > { %s153_s28 = sshll.u32 %s151_s27, 4  ;;  %s143_s29 = scalar_lea.vmem [#allocation4], %s405_s24  ;;  %s154_s28 = int_to_ptr.hbm [resolvable:$true] %s153_s28 }
   0xf   : > { %s155_s30 = sshll.u32 %s143_s29, 4  ;;  %p418_p9 = pnand %p421_p8, %p605_p3  ;;  %s156_s30 = int_to_ptr.vmem [resolvable:$true] %s155_s30 }
  0x10   : > { %p408_p10 = scmp.ge.s32.totalorder %s551_s14, 1  ;;  %p160_p11 = scmp.lt.s32.totalorder %s551_s14, 3 }
  0x11   : > { %s140_s3 = scalar_lea.sflag [#allocation5], %s139_s22 }
  0x12   : > { %420 = dma.hbm_to_vmem [thread:$0]  (!%p418_p9), %s154_s28, 128, %s156_s30, %s140_s3  }
  0x13   : > { %p161_p12 = pnand %p408_p10, %p160_p11 }
  0x14   : > { %s166_s4 = sand.u32 (!%p161_p12), 1, %s535_s10  }
  0x15   : > { %164 = sbr.rel (%p161_p12) target bundleno = 182 (0xb6), region = 24  ;;  %s409_s5 = sshll.u32 (!%p161_p12), %s166_s4, 3 }
  0x16   : > { %s167_s6 = scalar_lea.sflag (!%p161_p12), [#allocation5], %s166_s4  ;;  %s170_s7 = scalar_lea.vmem (!%p161_p12), [#allocation4], %s409_s5 }
  0x1a   : > { %526 = dma.done.wait (%p612_p7), %s167_s6, 128  }
  0x1b   : > { %528 = vsyncadd (%p612_p7), %s167_s6, 4294967168  ;;  %v553_v0 = vmov 0.0   ;;  %v227_v1 = vld [vmem:[%s170_s7] sm:$0xf]  ;;  %v235_v7 = vld [vmem:[%s170_s7 + $0x4] sm:$0xf] }
  0x1c   : > { %225 = vst [vmem:[#allocation2] sm:$0xf] %v553_v0  ;;  %v232_v3 = vmul.f32 %v227_v1, %v227_v1  ;;  %v240_v8 = vmul.f32 %v235_v7, %v235_v7  ;;  %vm247_vm0 = vcmask 1043456   ;;  %p207_p13 = scmp.lt.s32.totalorder %s543_s12, 1  ;;  %vm251_vm1 = vcmask 3072  }
  0x1d   : > { %226 = vst [vmem:[#allocation3] sm:$0xf] %v553_v0 }
  0x1e   : > { %s673_s12 = smov (!%p207_p13, %s543_s12), 1 }
  0x1f   : > { %s410_s8 = sshll.u32 %s673_s12, 2 }
  0x20   : > { %s212_s17 = scalar_lea.vmem %s661_s1, %s410_s8  ;;  %s220_s20 = scalar_lea.vmem %s662_s2, %s410_s8 }
  0x23   : > { %v228_v2 = vld [vmem:[#allocation2] sm:$0xf] }
  0x24   : > { %v229_v4 = vadd.f32 %v228_v2, %v227_v1  ;;  %v231_v5 = vld [vmem:[#allocation3] sm:$0xf] }
  0x25   : > { %v233_v6 = vadd.f32 %v232_v3, %v231_v5 }
  0x26   : > { %230 = vst [vmem:[#allocation2] sm:$0xf] %v229_v4 }
  0x27   : > { %234 = vst [vmem:[#allocation3] sm:$0xf] %v233_v6 }
  0x2d   : > { %v236_v9 = vld [vmem:[#allocation2] sm:$0xf] }
  0x2e   : > { %v237_v10 = vadd.f32 %v236_v9, %v235_v7  ;;  %v239_v11 = vld [vmem:[#allocation3] sm:$0xf] }
  0x2f   : > { %v241_v12 = vadd.f32 %v240_v8, %v239_v11 }
  0x30   : > { %238 = vst [vmem:[#allocation2] sm:$0xf] %v237_v10 }
  0x31   : > { %242 = vst [vmem:[#allocation3] sm:$0xf] %v241_v12 }
  0x37   : > { %v246_v13 = vld [vmem:[#allocation2] sm:$0xf] }
  0x38   : > { %v248_v14 = vsel %vm247_vm0, %v246_v13, 0.0  ;;  %v253_v15 = vld [vmem:[#allocation3] sm:$0xf] }
  0x39   : > { %249 = vadd.xlane.f32.xlu0 %v248_v14  ;;  %v254_v16 = vsel %vm247_vm0, %v253_v15, 0.0 }
  0x41   : > { %255 = vadd.xlane.f32.xlu0 %v254_v16 }
  0xac   : > { %v250_v17 = vpop.xlane.xlu0 %249 }
  0xad   : > { %252 = vst.msk [vmem:[%s212_s17] sm:$0xf] %vm251_vm1, %v250_v17 }
  0xb4   : > { %v256_v18 = vpop.xlane.xlu0 %255 }
  0xb5   : > { %257 = vst.msk [vmem:[%s220_s20] sm:$0xf] %vm251_vm1, %v256_v18 }
  0xb6 PF: > { %s16_s14 = sadd.s32 1, %s551_s14   ;;  %s665_s9 = smov %s535_s10 }
  0xb7   : > { %p13_p0 = scmp.ge.s32.totalorder %s16_s14, 4   ;;  %s666_s10 = smov %s539_s11 }
  0xb8   : > { %s667_s11 = smov %s618_s21  ;;  %s668_s12 = smov %s547_s13 }
  0xb9   : > { %s669_s13 = smov %s671_s16  ;;  %15 = sbr.rel (!%p13_p0) target bundleno = 4 (0x4), region = 84 }
  0xbe   :  { %307 = vsyncpa [#allocation5], 1 }
  0xbf   :  { %309 = vsyncpa [#allocation5 + $0x1], 1 }

</bundles_post_ra>
